<compile_context>
chip_gen: v7x
topology: tpu7x:2x2x1
jax: 0.10.0
libtpu: 0.0.40
codegen_flags: <defaults>
</compile_context>

<pallas_src>
import jax
import jax.numpy as jnp
from jax.experimental import pallas as pl
from jax.experimental.pallas import tpu as pltpu

_LANE = 128     # TPU lane width
_SUB = 8        # sublane alignment
_TN_MAX = 512   # batch-tile cap (bf16 inputs): VMEM-safe on v5e/v6e/v7x


def _round_up(x, m):
    return (x + m - 1) // m * m


# --------------------------------------------------------------------------
# Fused kernel: x_pad -> (linear1+bn1) -> (block, residual folded) ->
#               (bn2+classifier).  3 MXU matmuls, f32 accumulation/epilogue.
# --------------------------------------------------------------------------
def _fused_forward_kernel(x_ref, w1_ref, b1_ref, wb_ref, bb_ref,
                          wc_ref, bc_ref, o_ref):
    # linear1 + bn1 (folded into w1/b1)
    h = jnp.dot(x_ref[...], w1_ref[...], preferred_element_type=jnp.float32)
    h = h + b1_ref[...]

    # LinearPcDEQ2Block stand-in; residual identity folded into wb (= W_b + I)
    z = jnp.dot(h.astype(wb_ref.dtype), wb_ref[...],
                preferred_element_type=jnp.float32)
    z = jnp.maximum(z + bb_ref[...], 0.0)

    # bn2 + classifier (folded into wc/bc); lane-dense padded store
    out = jnp.dot(z.astype(wc_ref.dtype), wc_ref[...],
                  preferred_element_type=jnp.float32)
    o_ref[...] = (out + bc_ref[...]).astype(o_ref.dtype)


# --------------------------------------------------------------------------
# Wrapper
# --------------------------------------------------------------------------
def linear_pcdeq2_forward(x, params):
    """x: (N, ...) PyTorch-style input; Flatten() -> (N, 784)."""
    N = x.shape[0]
    x2 = x.reshape(N, -1).astype(jnp.float32)
    Din = x2.shape[1]
    Dpad, ch = params["w1"].shape
    opad = params["wc"].shape[1]
    num_classes = params["num_classes"]

    # Pad feature dim to lane-dense width and cast the HBM stream to bf16.
    x2 = jnp.pad(x2, ((0, 0), (0, Dpad - Din))).astype(jnp.bfloat16)

    # Adaptive batch tile: as large as possible up to the VMEM-safe cap.
    tn = min(_TN_MAX, _round_up(N, _SUB))
    Np = _round_up(N, tn)
    if Np != N:
        x2 = jnp.pad(x2, ((0, Np - N), (0, 0)))
    grid = (Np // tn,)

    flops = 2 * Np * (Dpad * ch + ch * ch + ch * opad)
    bytes_accessed = (Np * Dpad * 2                     # x (bf16)
                      + (Dpad * ch + ch * ch + ch * opad) * 2   # weights (bf16)
                      + (2 * ch + opad) * 4             # biases (f32)
                      + Np * opad * 4)                  # output (f32)

    def bcast(shape):
        return pl.BlockSpec(shape, lambda i: (0, 0))

    out = pl.pallas_call(
        _fused_forward_kernel,
        out_shape=jax.ShapeDtypeStruct((Np, opad), jnp.float32),
        grid=grid,
        in_specs=[
            pl.BlockSpec((tn, Dpad), lambda i: (i, 0)),  # x tile
            bcast((Dpad, ch)),                           # w1 (bn1 folded)
            bcast((1, ch)),                              # b1 (bn1 folded)
            bcast((ch, ch)),                             # block weight (+I)
            bcast((1, ch)),                              # block bias
            bcast((ch, opad)),                           # classifier (bn2 folded, padded)
            bcast((1, opad)),                            # classifier bias (padded)
        ],
        out_specs=pl.BlockSpec((tn, opad), lambda i: (i, 0)),
        compiler_params=pltpu.CompilerParams(
            dimension_semantics=("parallel",)),
        cost_estimate=pl.CostEstimate(
            flops=flops, transcendentals=0, bytes_accessed=bytes_accessed),
    )(x2, params["w1"], params["b1"], params["wb"], params["bb"],
      params["wc"], params["bc"])

    return out[:N, :num_classes]


# --------------------------------------------------------------------------
# Parameter construction (deterministic, synthetic; BN in eval mode, folded)
# --------------------------------------------------------------------------
def make_params(key, in_features=784, ch=128, num_classes=10):
    eps = 1e-5
    ks = jax.random.split(key, 14)

    # linear1 (PyTorch layout: weight (ch, in), bias (ch,))
    w1 = 0.05 * jax.random.normal(ks[0], (ch, in_features), jnp.float32)
    b1 = 0.05 * jax.random.normal(ks[1], (ch,), jnp.float32)

    # bn1 eval-mode running stats -> per-feature scale/shift
    g1 = 1.0 + 0.1 * jax.random.normal(ks[2], (ch,), jnp.float32)
    be1 = 0.1 * jax.random.normal(ks[3], (ch,), jnp.float32)
    rm1 = 0.05 * jax.random.normal(ks[4], (ch,), jnp.float32)
    rv1 = 0.5 + jnp.abs(jax.random.normal(ks[5], (ch,), jnp.float32))
    s1 = g1 / jnp.sqrt(rv1 + eps)
    t1 = be1 - rm1 * s1

    # block stand-in linear
    wb = 0.05 * jax.random.normal(ks[6], (ch, ch), jnp.float32)
    bb = 0.05 * jax.random.normal(ks[7], (ch,), jnp.float32)

    # bn2 eval-mode running stats -> per-feature scale/shift
    g2 = 1.0 + 0.1 * jax.random.normal(ks[8], (ch,), jnp.float32)
    be2 = 0.1 * jax.random.normal(ks[9], (ch,), jnp.float32)
    rm2 = 0.05 * jax.random.normal(ks[10], (ch,), jnp.float32)
    rv2 = 0.5 + jnp.abs(jax.random.normal(ks[11], (ch,), jnp.float32))
    s2 = g2 / jnp.sqrt(rv2 + eps)
    t2 = be2 - rm2 * s2

    # classifier
    wc = 0.05 * jax.random.normal(ks[12], (num_classes, ch), jnp.float32)
    bc = 0.05 * jax.random.normal(ks[13], (num_classes,), jnp.float32)

    # ---- fold bn1 into linear1, pad K to lane multiple ----
    Dpad = _round_up(in_features, _LANE)
    w1f = w1 * s1[:, None]                       # scale each output feature
    b1f = b1 * s1 + t1
    w1k = jnp.zeros((Dpad, ch), jnp.float32).at[:in_features, :].set(w1f.T)

    # ---- fold residual identity into block weight ----
    wbk = wb.T + jnp.eye(ch, dtype=jnp.float32)

    # ---- fold bn2 into classifier, pad output to lane width ----
    wck = wc.T                                   # (ch, num_classes)
    wckf = wck * s2[:, None]
    bcf = bc + t2 @ wck
    opad = _round_up(max(num_classes, _LANE), _LANE)
    wc_pad = jnp.zeros((ch, opad), jnp.float32).at[:, :num_classes].set(wckf)
    bc_pad = jnp.zeros((1, opad), jnp.float32).at[:, :num_classes].set(bcf)

    params = dict(
        w1=w1k.astype(jnp.bfloat16), b1=b1f.reshape(1, ch),
        wb=wbk.astype(jnp.bfloat16), bb=bb.reshape(1, ch),
        wc=wc_pad.astype(jnp.bfloat16), bc=bc_pad,
        num_classes=num_classes,
    )
    raw = dict(w1=w1, b1=b1, s1=s1, t1=t1, wb=wb, bb=bb,
               s2=s2, t2=t2, wc=wc, bc=bc)
    return params, raw


# --------------------------------------------------------------------------
if __name__ == "__main__":
    batch, ch, num_classes = 2, 128, 10
    key = jax.random.PRNGKey(0)
    kx, kp = jax.random.split(key)

    # MNIST-like input implied by Linear(784, ch): (N, 1, 28, 28)
    x = jax.random.normal(kx, (batch, 1, 28, 28), jnp.float32)
    params, raw = make_params(kp, in_features=784, ch=ch,
                              num_classes=num_classes)

    out = linear_pcdeq2_forward(x, params)
    out = jax.block_until_ready(out)

    hp = jax.lax.Precision.HIGHEST
    x2 = x.reshape(batch, -1).astype(jnp.float32)

    # Reference 1: same folded bf16 params / cast points in plain JAX
    # (validates the kernel itself tightly).
    Dpad = params["w1"].shape[0]
    x2p = jnp.pad(x2, ((0, 0), (0, Dpad - x2.shape[1]))).astype(jnp.bfloat16)
    h = jnp.dot(x2p, params["w1"], preferred_element_type=jnp.float32,
                precision=hp) + params["b1"]
    z = jnp.dot(h.astype(jnp.bfloat16), params["wb"],
                preferred_element_type=jnp.float32, precision=hp)
    z = jnp.maximum(z + params["bb"], 0.0)
    ref1 = (jnp.dot(z.astype(jnp.bfloat16), params["wc"],
                    preferred_element_type=jnp.float32, precision=hp)
            + params["bc"])[:, :num_classes]

    # Reference 2: original un-folded f32 eval-mode semantics
    # (validates the BN/residual folding; loose tol for the bf16 cast).
    h2 = jnp.dot(x2, raw["w1"].T, precision=hp) + raw["b1"]
    h2 = h2 * raw["s1"] + raw["t1"]
    z2 = jnp.maximum(jnp.dot(h2, raw["wb"].T, precision=hp) + raw["bb"] + h2, 0.0)
    z2 = z2 * raw["s2"] + raw["t2"]
    ref2 = jnp.dot(z2, raw["wc"].T, precision=hp) + raw["bc"]

    assert out.shape == (batch, num_classes), out.shape
    assert bool(jnp.all(jnp.isfinite(out)))
    assert bool(jnp.allclose(out, ref1, atol=1e-2, rtol=1e-2))
    assert bool(jnp.allclose(out, ref2, atol=1e-1, rtol=1e-1))
    print("KERNEL_OK")
</pallas_src>

<mosaic_0001>
module attributes {stable_mosaic.version = 11 : i64} {
  func.func @_fused_forward_kernel(%arg0: i32, %arg1: memref<8x896xbf16, #tpu.memory_space<vmem>>, %arg2: memref<896x128xbf16, #tpu.memory_space<vmem>>, %arg3: memref<1x128xf32, #tpu.memory_space<vmem>>, %arg4: memref<128x128xbf16, #tpu.memory_space<vmem>>, %arg5: memref<1x128xf32, #tpu.memory_space<vmem>>, %arg6: memref<128x128xbf16, #tpu.memory_space<vmem>>, %arg7: memref<1x128xf32, #tpu.memory_space<vmem>>, %arg8: memref<8x128xf32, #tpu.memory_space<vmem>>) attributes {dimension_semantics = [#tpu.dimension_semantics<parallel>], iteration_bounds = array<i64: 1>, scalar_prefetch = 0 : i64, scratch_operands = 0 : i64, tpu.core_type = #tpu.core_type<tc>, window_params = [{transform_indices = @transform_0, window_bounds = array<i64: 8, 896>}, {pipeline_mode = #tpu.pipeline_mode<synchronous>, transform_indices = @transform_1, window_bounds = array<i64: 896, 128>}, {pipeline_mode = #tpu.pipeline_mode<synchronous>, transform_indices = @transform_2, window_bounds = array<i64: 1, 128>}, {pipeline_mode = #tpu.pipeline_mode<synchronous>, transform_indices = @transform_3, window_bounds = array<i64: 128, 128>}, {pipeline_mode = #tpu.pipeline_mode<synchronous>, transform_indices = @transform_4, window_bounds = array<i64: 1, 128>}, {pipeline_mode = #tpu.pipeline_mode<synchronous>, transform_indices = @transform_5, window_bounds = array<i64: 128, 128>}, {pipeline_mode = #tpu.pipeline_mode<synchronous>, transform_indices = @transform_6, window_bounds = array<i64: 1, 128>}, {transform_indices = @transform_7, window_bounds = array<i64: 8, 128>}]} {
    %c0 = arith.constant 0 : index
    %c0_0 = arith.constant 0 : index
    %0 = vector.load %arg1[%c0, %c0_0] : memref<8x896xbf16, #tpu.memory_space<vmem>>, vector<8x896xbf16>
    %c0_1 = arith.constant 0 : index
    %c0_2 = arith.constant 0 : index
    %1 = vector.load %arg2[%c0_1, %c0_2] : memref<896x128xbf16, #tpu.memory_space<vmem>>, vector<896x128xbf16>
    %cst = arith.constant dense<0.000000e+00> : vector<8x128xf32>
    %2 = tpu.matmul %0, %1, %cst {dimension_numbers = #tpu.dot_dimension_numbers<[1], [0], [0], [1], [0, 0, 1, 1], [], []>} : vector<8x896xbf16>, vector<896x128xbf16>, vector<8x128xf32> -> vector<8x128xf32>
    %c0_3 = arith.constant 0 : index
    %c0_4 = arith.constant 0 : index
    %3 = vector.load %arg3[%c0_3, %c0_4] : memref<1x128xf32, #tpu.memory_space<vmem>>, vector<1x128xf32>
    %4 = vector.broadcast %3 : vector<1x128xf32> to vector<8x128xf32>
    %5 = arith.addf %2, %4 : vector<8x128xf32>
    %6 = arith.truncf %5 : vector<8x128xf32> to vector<8x128xbf16>
    %c0_5 = arith.constant 0 : index
    %c0_6 = arith.constant 0 : index
    %7 = vector.load %arg4[%c0_5, %c0_6] : memref<128x128xbf16, #tpu.memory_space<vmem>>, vector<128x128xbf16>
    %cst_7 = arith.constant dense<0.000000e+00> : vector<8x128xf32>
    %8 = tpu.matmul %6, %7, %cst_7 {dimension_numbers = #tpu.dot_dimension_numbers<[1], [0], [0], [1], [0, 0, 1, 1], [], []>} : vector<8x128xbf16>, vector<128x128xbf16>, vector<8x128xf32> -> vector<8x128xf32>
    %c0_8 = arith.constant 0 : index
    %c0_9 = arith.constant 0 : index
    %9 = vector.load %arg5[%c0_8, %c0_9] : memref<1x128xf32, #tpu.memory_space<vmem>>, vector<1x128xf32>
    %10 = vector.broadcast %9 : vector<1x128xf32> to vector<8x128xf32>
    %11 = arith.addf %8, %10 : vector<8x128xf32>
    %cst_10 = arith.constant 0.000000e+00 : f32
    %12 = vector.broadcast %cst_10 : f32 to vector<8x128xf32>
    %13 = arith.maximumf %11, %12 : vector<8x128xf32>
    %14 = arith.truncf %13 : vector<8x128xf32> to vector<8x128xbf16>
    %c0_11 = arith.constant 0 : index
    %c0_12 = arith.constant 0 : index
    %15 = vector.load %arg6[%c0_11, %c0_12] : memref<128x128xbf16, #tpu.memory_space<vmem>>, vector<128x128xbf16>
    %cst_13 = arith.constant dense<0.000000e+00> : vector<8x128xf32>
    %16 = tpu.matmul %14, %15, %cst_13 {dimension_numbers = #tpu.dot_dimension_numbers<[1], [0], [0], [1], [0, 0, 1, 1], [], []>} : vector<8x128xbf16>, vector<128x128xbf16>, vector<8x128xf32> -> vector<8x128xf32>
    %c0_14 = arith.constant 0 : index
    %c0_15 = arith.constant 0 : index
    %17 = vector.load %arg7[%c0_14, %c0_15] : memref<1x128xf32, #tpu.memory_space<vmem>>, vector<1x128xf32>
    %18 = vector.broadcast %17 : vector<1x128xf32> to vector<8x128xf32>
    %19 = arith.addf %16, %18 : vector<8x128xf32>
    %c0_16 = arith.constant 0 : index
    %c0_17 = arith.constant 0 : index
    %20 = vector.load %arg8[%c0_16, %c0_17] : memref<8x128xf32, #tpu.memory_space<vmem>>, vector<8x128xf32>
    tpu.vector_store %arg8[%c0_16, %c0_17], %19 {strides = array<i32>} : memref<8x128xf32, #tpu.memory_space<vmem>>, vector<8x128xf32>,
    return
  }
  func.func @transform_0(%arg0: i32) -> (i32, i32) {
    %c0_i32 = arith.constant 0 : i32
    %c0_i32_0 = arith.constant 0 : i32
    return %arg0, %c0_i32 : i32, i32
  }
  func.func @transform_1(%arg0: i32) -> (i32, i32) {
    %c0_i32 = arith.constant 0 : i32
    %c0_i32_0 = arith.constant 0 : i32
    %c0_i32_1 = arith.constant 0 : i32
    return %c0_i32, %c0_i32_0 : i32, i32
  }
  func.func @transform_2(%arg0: i32) -> (i32, i32) {
    %c0_i32 = arith.constant 0 : i32
    %c0_i32_0 = arith.constant 0 : i32
    %c0_i32_1 = arith.constant 0 : i32
    return %c0_i32, %c0_i32_0 : i32, i32
  }
  func.func @transform_3(%arg0: i32) -> (i32, i32) {
    %c0_i32 = arith.constant 0 : i32
    %c0_i32_0 = arith.constant 0 : i32
    %c0_i32_1 = arith.constant 0 : i32
    return %c0_i32, %c0_i32_0 : i32, i32
  }
  func.func @transform_4(%arg0: i32) -> (i32, i32) {
    %c0_i32 = arith.constant 0 : i32
    %c0_i32_0 = arith.constant 0 : i32
    %c0_i32_1 = arith.constant 0 : i32
    return %c0_i32, %c0_i32_0 : i32, i32
  }
  func.func @transform_5(%arg0: i32) -> (i32, i32) {
    %c0_i32 = arith.constant 0 : i32
    %c0_i32_0 = arith.constant 0 : i32
    %c0_i32_1 = arith.constant 0 : i32
    return %c0_i32, %c0_i32_0 : i32, i32
  }
  func.func @transform_6(%arg0: i32) -> (i32, i32) {
    %c0_i32 = arith.constant 0 : i32
    %c0_i32_0 = arith.constant 0 : i32
    %c0_i32_1 = arith.constant 0 : i32
    return %c0_i32, %c0_i32_0 : i32, i32
  }
  func.func @transform_7(%arg0: i32) -> (i32, i32) {
    %c0_i32 = arith.constant 0 : i32
    %c0_i32_0 = arith.constant 0 : i32
    return %arg0, %c0_i32 : i32, i32
  }
}

</mosaic_0001>

<bundles_post_ra>
// kernel: tpu_custom_call.1
= control target key start
LH: loop header
LB: loop body
LE: loop exit
PB: predicated region body
PF: predicated region fallthrough
CT: control target
= control target key end

     0   :  { %12 = vsyncpa [#allocation3], 0  ;;  %s1566_s0 = inlined_call_operand.hbm [shape: bf16[8,896], index: 0, kind: input, shape index: {}]   ;;  %s1567_s1 = inlined_call_operand.hbm [shape: bf16[896,128], index: 1, kind: input, shape index: {}]   ;;  %s1568_s2 = inlined_call_operand.vmem [shape: f32[1,128], index: 2, kind: input, shape index: {}]   ;;  %s1569_s3 = inlined_call_operand.hbm [shape: bf16[128,128], index: 3, kind: input, shape index: {}]   ;;  %s1570_s4 = inlined_call_operand.vmem [shape: f32[1,128], index: 4, kind: input, shape index: {}]   ;;  %s1571_s5 = inlined_call_operand.hbm [shape: bf16[128,128], index: 5, kind: input, shape index: {}]   ;;  %s1572_s6 = inlined_call_operand.vmem [shape: f32[1,128], index: 6, kind: input, shape index: {}]   ;;  %s1573_s7 = inlined_call_operand.hbm [shape: f32[8,128], index: 7, kind: output, shape index: {}]  }
   0x1   :  { %13 = vsyncpa [#allocation6], 0 }
   0x2   :  { %14 = vsyncpa [#allocation9], 0 }
   0x3   :  { %15 = vsyncpa [#allocation4], 0  ;;  %s1409_s24 = smov [#allocation5]   ;;  %s1291_s28 = scalar_lea.hbm %s1567_s1, 7168 }
   0x4   :  { %s31_s25 = sshll.u32 %s1409_s24, 4  ;;  %p1292_p0 = scmp.ne.s32.totalorder %s1567_s1, %s1291_s28  ;;  %s32_s25 = int_to_ptr.vmem [resolvable:$true] %s31_s25 }
   0x5   :  { %p1295_p1 = scmp.lt.u32.totalorder %s1291_s28, %s1567_s1 }
   0x7   :  { %p1297_p2 = pnand %p1295_p1, %p1292_p0 }
   0x9   :  { %1300 = shalt.err (!%p1297_p2)
}
   0xa   :  { %s1301_s10 = scalar_lea.vmem %s32_s25, 7168  ;;  %p1306_p4 = scmp.lt.s32.totalorder %s32_s25, %s32_s25 }
   0xb   :  { %p1302_p3 = scmp.ne.s32.totalorder %s32_s25, %s1301_s10  ;;  %p1307_p5 = scmp.lt.s32.totalorder %s1301_s10, %s1301_s10 }
   0xd   :  { %p1308_p6 = por %p1307_p5, %p1306_p4 }
   0xf   :  { %p1309_p7 = pnand %p1308_p6, %p1302_p3 }
  0x11   :  { %1312 = shalt.err (!%p1309_p7)
}
  0x12   :  { %s1410_s11 = smov 64   ;;  %s1411_s12 = smov 4  }
  0x13   :  { %37 = dma.hbm_to_vmem [thread:$0]  %s1567_s1, 7168, %s32_s25, [#allocation6], %s1410_s11, %s1410_s11, %s1411_s12  }
  0x14   :  { %s1412_s15 = smov [#allocation2]   ;;  %s1413_s17 = smov [#allocation7]  }
  0x15   :  { %s22_s16 = sshll.u32 %s1412_s15, 4  ;;  %s45_s18 = sshll.u32 %s1413_s17, 4  ;;  %s23_s16 = int_to_ptr.vmem [resolvable:$true] %s22_s16  ;;  %s46_s18 = int_to_ptr.vmem [resolvable:$true] %s45_s18 }
  0x16   :  { %s1313_s21 = scalar_lea.hbm %s1566_s0, 448 }
  0x17   :  { %p1314_p8 = scmp.ne.s32.totalorder %s1566_s0, %s1313_s21  ;;  %p1317_p9 = scmp.lt.u32.totalorder %s1313_s21, %s1566_s0 }
  0x19   :  { %p1319_p10 = pnand %p1317_p9, %p1314_p8 }
  0x1b   :  { %1322 = shalt.err (!%p1319_p10)
}
  0x1c   :  { %s1323_s1 = scalar_lea.vmem %s23_s16, 448  ;;  %p1328_p12 = scmp.lt.s32.totalorder %s23_s16, %s23_s16 }
  0x1d   :  { %p1324_p11 = scmp.ne.s32.totalorder %s23_s16, %s1323_s1  ;;  %p1329_p13 = scmp.lt.s32.totalorder %s1323_s1, %s1323_s1 }
  0x1f   :  { %p1330_p0 = por %p1329_p13, %p1328_p12 }
  0x21   :  { %p1331_p1 = pnand %p1330_p0, %p1324_p11 }
  0x23   :  { %1334 = shalt.err (!%p1331_p1)
}
  0x24   :  { %25 = dma.hbm_to_vmem [thread:$0]  %s1566_s0, 448, %s23_s16, [#allocation3]  }
  0x25   :  { %s1335_s30 = scalar_lea.hbm %s1569_s3, 1024 }
  0x26   :  { %p1336_p2 = scmp.ne.s32.totalorder %s1569_s3, %s1335_s30  ;;  %p1339_p3 = scmp.lt.u32.totalorder %s1335_s30, %s1569_s3 }
  0x28   :  { %p1341_p4 = pnand %p1339_p3, %p1336_p2 }
  0x2a   :  { %1344 = shalt.err (!%p1341_p4)
}
  0x2b   :  { %s1345_s14 = scalar_lea.vmem %s46_s18, 1024  ;;  %p1350_p6 = scmp.lt.s32.totalorder %s46_s18, %s46_s18 }
  0x2c   :  { %p1346_p5 = scmp.ne.s32.totalorder %s46_s18, %s1345_s14  ;;  %p1351_p7 = scmp.lt.s32.totalorder %s1345_s14, %s1345_s14 }
  0x2e   :  { %p1352_p8 = por %p1351_p7, %p1350_p6 }
  0x30   :  { %p1353_p9 = pnand %p1352_p8, %p1346_p5 }
  0x32   :  { %1356 = shalt.err (!%p1353_p9)
}
  0x33   :  { %51 = dma.hbm_to_vmem [thread:$0]  %s1569_s3, 1024, %s46_s18, [#allocation6], %s1410_s11, %s1410_s11, %s1411_s12  }
  0x34   :  { %s1414_s16 = smov [#allocation8]   ;;  %s1357_s21 = scalar_lea.hbm %s1571_s5, 1024 }
  0x35   :  { %s59_s17 = sshll.u32 %s1414_s16, 4  ;;  %p1358_p10 = scmp.ne.s32.totalorder %s1571_s5, %s1357_s21  ;;  %s60_s17 = int_to_ptr.vmem [resolvable:$true] %s59_s17 }
  0x36   :  { %p1361_p11 = scmp.lt.u32.totalorder %s1357_s21, %s1571_s5 }
  0x38   :  { %p1363_p12 = pnand %p1361_p11, %p1358_p10 }
  0x3a   :  { %1366 = shalt.err (!%p1363_p12)
}
  0x3b   :  { %s1367_s1 = scalar_lea.vmem %s60_s17, 1024  ;;  %p1372_p0 = scmp.lt.s32.totalorder %s60_s17, %s60_s17 }
  0x3c   :  { %p1368_p13 = scmp.ne.s32.totalorder %s60_s17, %s1367_s1  ;;  %p1373_p1 = scmp.lt.s32.totalorder %s1367_s1, %s1367_s1 }
  0x3e   :  { %p1374_p2 = por %p1373_p1, %p1372_p0 }
  0x40   :  { %p1375_p3 = pnand %p1374_p2, %p1368_p13 }
  0x42   :  { %1378 = shalt.err (!%p1375_p3)
}
  0x43   :  { %65 = dma.hbm_to_vmem [thread:$0]  %s1571_s5, 1024, %s60_s17, [#allocation9], %s1410_s11, %s1410_s11, %s1411_s12  }
  0x44   :  { %1401 = dma.done.wait [#allocation3], 448  }
  0x45   :  { %1402 = vsyncadd [#allocation3], 4294966848 }
  0x46   :  { %1403 = dma.done.wait [#allocation6], 8192  }
  0x47   :  { %1404 = vsyncadd [#allocation6], 4294959104 }
  0x48   :  { %1405 = dma.done.wait [#allocation9], 1024  }
  0x49   :  { %1406 = vsyncadd [#allocation9], 4294966272  ;;  %v1212_v0 = vld [vmem:[#allocation5 + $0x40] sm:$0xff]   ;;  %v1216_v4 = vld [vmem:[#allocation5 + $0x48] sm:$0xff]   ;;  %v1415_v42 = vmov 0.0   ;;  %vm1416_vm0 = vmmov 0  }
  0x4a   :  { %v1213_v1 = vld [vmem:[#allocation5] sm:$0xff]   ;;  %1050 = vmatprep.subr.bf16.mxu0 %v1212_v0  ;;  %v1217_v5 = vld [vmem:[#allocation5 + $0x8] sm:$0xff]   ;;  %v1220_v8 = vld [vmem:[#allocation5 + $0x50] sm:$0xff]   ;;  %s1417_s28 = smov [#allocation10]  }
  0x4b   :  { %v1214_v2 = vld [vmem:[#allocation5 + $0xc0] sm:$0xff]   ;;  %1051 = vmatpush3.bf16.msra.mxu0 %v1213_v1  ;;  %v1218_v6 = vld [vmem:[#allocation5 + $0xc8] sm:$0xff]   ;;  %v1221_v9 = vld [vmem:[#allocation5 + $0x10] sm:$0xff]   ;;  %s957_s29 = sshll.u32 %s1417_s28, 4  ;;  %s958_s29 = int_to_ptr.vmem [resolvable:$true] %s957_s29 }
  0x4c   :  { %v1215_v3 = vld [vmem:[#allocation5 + $0x80] sm:$0xff]   ;;  %1072 = vmatprep.subr.bf16.mxu1 %v1214_v2  ;;  %1052 = vmatprep.subr.bf16.mxu0 %v1216_v4  ;;  %v1219_v7 = vld [vmem:[#allocation5 + $0x88] sm:$0xff]   ;;  %v1222_v10 = vld [vmem:[#allocation5 + $0xd0] sm:$0xff]   ;;  %p1384_p5 = scmp.lt.s32.totalorder %s958_s29, %s958_s29 }
  0x4d   :  { %1073 = vmatpush3.bf16.msra.mxu1 %v1215_v3  ;;  %v1223_v11 = vld [vmem:[#allocation5 + $0x90] sm:$0xff]   ;;  %v1224_v12 = vld [vmem:[#allocation5 + $0x58] sm:$0xff]   ;;  %v1228_v16 = vld [vmem:[#allocation5 + $0x60] sm:$0xff]  }
  0x4e   :  { %1074 = vmatprep.subr.bf16.mxu1 %v1218_v6  ;;  %v1225_v13 = vld [vmem:[#allocation5 + $0x18] sm:$0xff]   ;;  %v1229_v17 = vld [vmem:[#allocation5 + $0x20] sm:$0xff]   ;;  %v1232_v20 = vld [vmem:[#allocation5 + $0x68] sm:$0xff]  }
  0x4f   :  { %1053 = vmatpush3.bf16.msra.mxu0 %v1217_v5  ;;  %v1226_v14 = vld [vmem:[#allocation5 + $0xd8] sm:$0xff]   ;;  %v1230_v18 = vld [vmem:[#allocation5 + $0xe0] sm:$0xff]   ;;  %v1233_v21 = vld [vmem:[#allocation5 + $0x28] sm:$0xff]  }
  0x50   :  { %1054 = vmatprep.subr.bf16.mxu0 %v1220_v8  ;;  %v1227_v15 = vld [vmem:[#allocation5 + $0x98] sm:$0xff]   ;;  %v1231_v19 = vld [vmem:[#allocation5 + $0xa0] sm:$0xff]   ;;  %v1234_v22 = vld [vmem:[#allocation5 + $0xe8] sm:$0xff]  }
  0x51   :  { %1075 = vmatpush3.bf16.msra.mxu1 %v1219_v7  ;;  %v1235_v23 = vld [vmem:[#allocation5 + $0xa8] sm:$0xff]   ;;  %v1236_v24 = vld [vmem:[#allocation5 + $0x70] sm:$0xff]   ;;  %v1240_v28 = vld [vmem:[#allocation5 + $0x78] sm:$0xff]  }
  0x52   :  { %1076 = vmatprep.subr.bf16.mxu1 %v1222_v10  ;;  %v1237_v25 = vld [vmem:[#allocation5 + $0x30] sm:$0xff]   ;;  %v1241_v29 = vld [vmem:[#allocation5 + $0x38] sm:$0xff]   ;;  %v81_v31 = vld [vmem:[#allocation2] sm:$0xff] }
  0x53   :  { %1055 = vmatpush3.bf16.msra.mxu0 %v1221_v9  ;;  %v1238_v26 = vld [vmem:[#allocation5 + $0xf0] sm:$0xff]   ;;  %v1242_v30 = vld [vmem:[#allocation5 + $0xf8] sm:$0xff]   ;;  %v969_v32 = vcombine.low %v81_v31, %v81_v31  ;;  %v970_v33 = vcombine.high %v81_v31, %v81_v31  ;;  %v1246_v35 = vld [vmem:[#allocation5 + $0x140] sm:$0xff]  }
  0x54   :  { %1056 = vmatprep.subr.bf16.mxu0 %v1224_v12  ;;  %v1239_v27 = vld [vmem:[#allocation5 + $0xb0] sm:$0xff]   ;;  %v1245_v34 = vld [vmem:[#allocation5 + $0xb8] sm:$0xff]   ;;  %v1249_v39 = vld [vmem:[#allocation5 + $0x100] sm:$0xff]  }
  0x55   :  { %1077 = vmatpush3.bf16.msra.mxu1 %v1223_v11  ;;  %v82_v36 = vld [vmem:[#allocation2 + $0x8] sm:$0xff]  ;;  %597 = vmatprep.mubr.bf16.mxu0 %v970_v33  ;;  %v1250_v40 = vld [vmem:[#allocation5 + $0x180] sm:$0xff]   ;;  %v1257_v48 = vld [vmem:[#allocation5 + $0x158] sm:$0xff]  }
  0x56   :  { %1078 = vmatprep.subr.bf16.mxu1 %v1226_v14  ;;  %v971_v37 = vcombine.low %v82_v36, %v82_v36  ;;  %v972_v38 = vcombine.high %v82_v36, %v82_v36  ;;  %v1251_v41 = vld [vmem:[#allocation5 + $0x148] sm:$0xff]   ;;  %v1254_v45 = vld [vmem:[#allocation5 + $0x150] sm:$0xff]   ;;  %v1258_v49 = vld [vmem:[#allocation5 + $0x118] sm:$0xff]  }
  0x57   :  { %1057 = vmatpush3.bf16.msra.mxu0 %v1225_v13  ;;  %v1252_v43 = vld [vmem:[#allocation5 + $0x108] sm:$0xff]   ;;  %v1255_v46 = vld [vmem:[#allocation5 + $0x110] sm:$0xff]   ;;  %v1260_v50 = vld [vmem:[#allocation5 + $0x160] sm:$0xff]  }
  0x58   :  { %1058 = vmatprep.subr.bf16.mxu0 %v1228_v16  ;;  %637 = vmatprep.mubr.bf16.mxu1 %v972_v38  ;;  %v1253_v44 = vld [vmem:[#allocation5 + $0x188] sm:$0xff]   ;;  %v1256_v47 = vld [vmem:[#allocation5 + $0x190] sm:$0xff]   ;;  %v1259_v51 = vld [vmem:[#allocation5 + $0x198] sm:$0xff]  }
  0x59   :  { %1079 = vmatpush3.bf16.msra.mxu1 %v1227_v15  ;;  %v1261_v52 = vld [vmem:[#allocation5 + $0x120] sm:$0xff]   ;;  %v1263_v53 = vld [vmem:[#allocation5 + $0x168] sm:$0xff]   ;;  %v1266_v56 = vld [vmem:[#allocation5 + $0x170] sm:$0xff]  }
  0x5a   :  { %1080 = vmatprep.subr.bf16.mxu1 %v1230_v18  ;;  %v1262_v54 = vld [vmem:[#allocation5 + $0x1a0] sm:$0xff]   ;;  %v1264_v55 = vld [vmem:[#allocation5 + $0x128] sm:$0xff]   ;;  %v1267_v58 = vld [vmem:[#allocation5 + $0x130] sm:$0xff]  }
  0x5b   :  { %1059 = vmatpush3.bf16.msra.mxu0 %v1229_v17  ;;  %v1265_v57 = vld [vmem:[#allocation5 + $0x1a8] sm:$0xff]   ;;  %v83_v59 = vld [vmem:[#allocation2 + $0x10] sm:$0xff]  ;;  %v1274_v2 = vld [vmem:[#allocation2 + $0x18] ss:$0 sps:$4 sm:$0xff]  }
  0x5c   :  { %1060 = vmatprep.subr.bf16.mxu0 %v1232_v20  ;;  %v1268_v60 = vld [vmem:[#allocation5 + $0x1b0] sm:$0xff]   ;;  %v974_v61 = vcombine.high %v83_v59, %v83_v59  ;;  %v1269_v62 = vld [vmem:[#allocation5 + $0x178] sm:$0xff]   ;;  %v973_v1 = vcombine.low %v83_v59, %v83_v59  ;;  %v1275_v3 = vld [vmem:[#allocation7] sm:$0xff]  }
  0x5d   :  { %1081 = vmatpush3.bf16.msra.mxu1 %v1231_v19  ;;  %v1270_v63 = vld [vmem:[#allocation5 + $0x138] sm:$0xff]   ;;  %v1276_v4 = vld [vmem:[#allocation7 + $0x8] sm:$0xff]   ;;  %v1277_v5 = vld [vmem:[#allocation7 + $0x10] sm:$0xff]  }
  0x5e   :  { %1082 = vmatprep.subr.bf16.mxu1 %v1234_v22  ;;  %v1273_v0 = vld [vmem:[#allocation5 + $0x1b8] sm:$0xff]   ;;  %v1279_v7 = vld [vmem:[#allocation7 + $0x20] sm:$0xff]   ;;  %v1280_v8 = vld [vmem:[#allocation7 + $0x28] sm:$0xff]  }
  0x5f   :  { %1061 = vmatpush3.bf16.msra.mxu0 %v1233_v21  ;;  %v1278_v6 = vld [vmem:[#allocation7 + $0x18] sm:$0xff]   ;;  %v1281_v9 = vld [vmem:[#allocation7 + $0x30] sm:$0xff]   ;;  %v1283_v11 = vld [vmem:[#allocation8] sm:$0xff]  }
  0x60   :  { %1062 = vmatprep.subr.bf16.mxu0 %v1236_v24  ;;  %v1282_v10 = vld [vmem:[#allocation7 + $0x38] sm:$0xff]   ;;  %v1284_v12 = vld [vmem:[#allocation8 + $0x8] sm:$0xff]   ;;  %v1285_v13 = vld [vmem:[#allocation8 + $0x10] sm:$0xff]  }
  0x61   :  { %1083 = vmatpush3.bf16.msra.mxu1 %v1235_v23  ;;  %v1286_v14 = vld [vmem:[#allocation8 + $0x18] sm:$0xff]   ;;  %v1287_v15 = vld [vmem:[#allocation8 + $0x20] sm:$0xff]   ;;  %v1288_v16 = vld [vmem:[#allocation8 + $0x28] sm:$0xff]  }
  0x62   :  { %1084 = vmatprep.subr.bf16.mxu1 %v1238_v26  ;;  %v968_v18 = vld [vmem:[%s1568_s2] ss:$0 sm:$0xff] }
  0x63   :  { %1063 = vmatpush3.bf16.msra.mxu0 %v1237_v25 }
  0x64   :  { %1064 = vmatprep.subr.bf16.mxu0 %v1240_v28 }
  0x65   :  { %1085 = vmatpush3.bf16.msra.mxu1 %v1239_v27 }
  0x66   :  { %1086 = vmatprep.subr.bf16.mxu1 %v1242_v30 }
  0x67   :  { %1065 = vmatpush3.bf16.msra.mxu0 %v1241_v29 }
  0x68   :  { %1094 = vmatprep.subr.bf16.mxu0 %v1246_v35 }
  0x69   :  { %1087 = vmatpush3.bf16.msra.mxu1 %v1245_v34 }
  0x6a   :  { %598 = vmatmul.mubr.bf16.vlgmr.msra.gmra.mrb[0].mxu0 %v969_v32  ;;  %1143 = vmatprep.subr.bf16.mxu1 %v1415_v42 }
  0x6b   :  { %1095 = vmatpush3.bf16.msra.mxu0 %v1249_v39  ;;  %677 = vmatprep.mubr.bf16.mxu0 %v974_v61 }
  0x6c   :  { %638 = vmatmul.mubr.bf16.vlgmr.msra.gmra.mrb[0].mxu1 %v971_v37  ;;  %1096 = vmatprep.subr.bf16.mxu0 %v1251_v41 }
  0x6d   :  { %1144 = vmatpush3.bf16.msra.mxu1 %v1250_v40  ;;  %1159 = vmatprep.mubr.msk.bf16.mxu1 %vm1416_vm0, %v1415_v42 }
  0x6e   :  { %1145 = vmatprep.subr.bf16.mxu1 %v1415_v42 }
  0x6f   :  { %1097 = vmatpush3.bf16.msra.mxu0 %v1252_v43  ;;  %v1289_v43 = vld [vmem:[#allocation8 + $0x30] sm:$0xff]  }
  0x70   :  { %1098 = vmatprep.subr.bf16.mxu0 %v1254_v45  ;;  %v1032_v45 = vld [vmem:[%s1570_s4] ss:$0 sm:$0xff]  ;;  %s1379_s4 = scalar_lea.vmem %s958_s29, 128 }
  0x71   :  { %1146 = vmatpush3.bf16.msra.mxu1 %v1253_v44  ;;  %v1290_v44 = vld [vmem:[#allocation8 + $0x38] sm:$0xff]   ;;  %p1380_p4 = scmp.ne.s32.totalorder %s958_s29, %s1379_s4  ;;  %p1385_p6 = scmp.lt.s32.totalorder %s1379_s4, %s1379_s4 }
  0x72   :  { %1147 = vmatprep.subr.bf16.mxu1 %v1415_v42 }
  0x73   :  { %1099 = vmatpush3.bf16.msra.mxu0 %v1255_v46  ;;  %p1386_p7 = por %p1385_p6, %p1384_p5 }
  0x74   :  { %1100 = vmatprep.subr.bf16.mxu0 %v1257_v48 }
  0x75   :  { %1148 = vmatpush3.bf16.msra.mxu1 %v1256_v47  ;;  %p1387_p8 = pnand %p1386_p7, %p1380_p4 }
  0x76   :  { %1149 = vmatprep.subr.bf16.mxu1 %v1415_v42 }
  0x77   :  { %1101 = vmatpush3.bf16.msra.mxu0 %v1258_v49 }
  0x78   :  { %1102 = vmatprep.subr.bf16.mxu0 %v1260_v50 }
  0x79   :  { %1150 = vmatpush3.bf16.msra.mxu1 %v1259_v51 }
  0x7a   :  { %1151 = vmatprep.subr.bf16.mxu1 %v1415_v42 }
  0x7b   :  { %1103 = vmatpush3.bf16.msra.mxu0 %v1261_v52 }
  0x7c   :  { %1104 = vmatprep.subr.bf16.mxu0 %v1263_v53  ;;  %v1041_v53 = vld [vmem:[%s1572_s6] ss:$0 sm:$0xff] }
  0x7d   :  { %1152 = vmatpush3.bf16.msra.mxu1 %v1262_v54 }
  0x7e   :  { %1153 = vmatprep.subr.bf16.mxu1 %v1415_v42 }
  0x7f   :  { %1105 = vmatpush3.bf16.msra.mxu0 %v1264_v55 }
  0x80   :  { %1106 = vmatprep.subr.bf16.mxu0 %v1266_v56 }
  0x81   :  { %1154 = vmatpush3.bf16.msra.mxu1 %v1265_v57 }
  0x82   :  { %1155 = vmatprep.subr.bf16.mxu1 %v1415_v42 }
  0x83   :  { %1107 = vmatpush3.bf16.msra.mxu0 %v1267_v58 }
  0x84   :  { %1108 = vmatprep.subr.bf16.mxu0 %v1269_v62 }
  0x85   :  { %1156 = vmatpush3.bf16.msra.mxu1 %v1268_v60 }
  0x86   :  { %1157 = vmatprep.subr.bf16.mxu1 %v1415_v42 }
  0x87   :  { %1109 = vmatpush3.bf16.msra.mxu0 %v1270_v63 }
  0x88   :  { %1163 = vmatprep.subr.bf16.mxu0 %v1415_v42 }
  0x89   :  { %1158 = vmatpush3.bf16.msra.mxu1 %v1273_v0 }
  0x8a   :  { %678 = vmatmul.mubr.bf16.vlgmr.msra.gmra.mrb[4].mxu0 %v973_v1  ;;  %1183 = vmatprep.subr.bf16.mxu1 %v1415_v42 }
  0x8b   :  { %1179 = vmatprep.mubr.msk.bf16.mxu0 %vm1416_vm0, %v1415_v42  ;;  %1164 = vmatpush3.bf16.msra.mxu0 %v1275_v3 }
  0x8c   :  { %1160 = vmatmul.mubr.bf16.vlgmr.msra.gmra.mrb[4].mxu1 %v1274_v2  ;;  %1165 = vmatprep.subr.bf16.mxu0 %v1415_v42 }
  0x8d   :  { %1199 = vmatprep.mubr.msk.bf16.mxu1 %vm1416_vm0, %v1415_v42  ;;  %1184 = vmatpush3.bf16.msra.mxu1 %v1283_v11 }
  0x8e   :  { %1185 = vmatprep.subr.bf16.mxu1 %v1415_v42 }
  0x8f   :  { %1166 = vmatpush3.bf16.msra.mxu0 %v1276_v4 }
  0x90   :  { %1167 = vmatprep.subr.bf16.mxu0 %v1415_v42 }
  0x91   :  { %1186 = vmatpush3.bf16.msra.mxu1 %v1284_v12 }
  0x92   :  { %1187 = vmatprep.subr.bf16.mxu1 %v1415_v42 }
  0x93   :  { %1168 = vmatpush3.bf16.msra.mxu0 %v1277_v5 }
  0x94   :  { %1169 = vmatprep.subr.bf16.mxu0 %v1415_v42 }
  0x95   :  { %1188 = vmatpush3.bf16.msra.mxu1 %v1285_v13 }
  0x96   :  { %1189 = vmatprep.subr.bf16.mxu1 %v1415_v42 }
  0x97   :  { %1170 = vmatpush3.bf16.msra.mxu0 %v1278_v6 }
  0x98   :  { %1171 = vmatprep.subr.bf16.mxu0 %v1415_v42 }
  0x99   :  { %1190 = vmatpush3.bf16.msra.mxu1 %v1286_v14 }
  0x9a   :  { %1191 = vmatprep.subr.bf16.mxu1 %v1415_v42 }
  0x9b   :  { %1172 = vmatpush3.bf16.msra.mxu0 %v1279_v7 }
  0x9c   :  { %1173 = vmatprep.subr.bf16.mxu0 %v1415_v42 }
  0x9d   :  { %1192 = vmatpush3.bf16.msra.mxu1 %v1287_v15 }
  0x9e   :  { %1193 = vmatprep.subr.bf16.mxu1 %v1415_v42 }
  0x9f   :  { %1174 = vmatpush3.bf16.msra.mxu0 %v1280_v8 }
  0xa0   :  { %1175 = vmatprep.subr.bf16.mxu0 %v1415_v42 }
  0xa1   :  { %1194 = vmatpush3.bf16.msra.mxu1 %v1288_v16 }
  0xa2   :  { %1195 = vmatprep.subr.bf16.mxu1 %v1415_v42 }
  0xa3   :  { %1176 = vmatpush3.bf16.msra.mxu0 %v1281_v9 }
  0xa4   :  { %1177 = vmatprep.subr.bf16.mxu0 %v1415_v42 }
  0xa5   :  { %1196 = vmatpush3.bf16.msra.mxu1 %v1289_v43 }
  0xa6   :  { %1197 = vmatprep.subr.bf16.mxu1 %v1415_v42 }
  0xa7   :  { %1178 = vmatpush3.bf16.msra.mxu0 %v1282_v10 }
  0xa9   :  { %1198 = vmatpush3.bf16.msra.mxu1 %v1290_v44 }
 0x13d   :  { %v1066_v17 = vpop.f32.mrb[0].mxu0 }
 0x13e   :  { %v1067_v19 = vpop.f32.mrb[1].mxu0 }
 0x13f   :  { %v1068_v20 = vadd.f32 %v1067_v19, %v1066_v17  ;;  %v1069_v21 = vpop.f32.mrb[2].mxu0  ;;  %v1088_v22 = vpop.f32.mrb[0].mxu1 }
 0x140   :  { %v1070_v23 = vpop.f32.mrb[3].mxu0  ;;  %v1089_v24 = vpop.f32.mrb[1].mxu1 }
 0x141   :  { %v600_v25 = vadd.f32 %v1068_v20, %v968_v18  ;;  %v1090_v26 = vadd.f32 %v1089_v24, %v1088_v22  ;;  %v1091_v27 = vpop.f32.mrb[2].mxu1 }
 0x142   :  { %v1092_v28 = vpop.f32.mrb[3].mxu1 }
 0x143   :  { %v640_v29 = vadd.f32 %v1090_v26, %v600_v25 }
 0x15d   :  { %v1110_v30 = vpop.f32.mrb[4].mxu0 }
 0x15e   :  { %v1111_v31 = vpop.f32.mrb[5].mxu0 }
 0x15f   :  { %v1112_v32 = vadd.f32 %v1111_v31, %v1110_v30  ;;  %v1113_v33 = vpop.f32.mrb[6].mxu0  ;;  %v719_v34 = vpop.f32.mrb[4].mxu1 }
 0x160   :  { %v1114_v35 = vpop.f32.mrb[7].mxu0  ;;  %v1161_v36 = vpop.f32.mrb[5].mxu1 }
 0x161   :  { %v680_v37 = vadd.f32 %v1112_v32, %v640_v29  ;;  %v722_v38 = vpop.f32.mrb[6].mxu1 }
 0x162   :  { %v1162_v39 = vpop.f32.mrb[7].mxu1 }
 0x163   :  { %v720_v40 = vadd.f32 %v719_v34, %v680_v37 }
 0x165   :  { %v725_v41 = vpack.c.bf16 %v720_v40, %v720_v40 }
 0x167   :  { %1180 = vmatmul.mubr.bf16.vlgmr.msra.gmra.mrb[8].mxu0 %v725_v41 }
 0x23a   :  { %v831_v46 = vpop.f32.mrb[8].mxu0 }
 0x23b   :  { %v832_v47 = vadd.f32 %v1032_v45, %v831_v46  ;;  %v1181_v48 = vpop.f32.mrb[9].mxu0 }
 0x23c   :  { %v834_v49 = vpop.f32.mrb[10].mxu0 }
 0x23d   :  { %v837_v50 = vmax.f32 %v832_v47, 0.0  ;;  %v1182_v51 = vpop.f32.mrb[11].mxu0 }
 0x23f   :  { %v838_v52 = vpack.c.bf16 %v837_v50, %v837_v50 }
 0x241   :  { %1200 = vmatmul.mubr.bf16.vlgmr.msra.gmra.mrb[8].mxu1 %v838_v52 }
 0x314   :  { %v944_v42 = vpop.f32.mrb[8].mxu1 }
 0x315   :  { %v945_v54 = vadd.f32 %v1041_v53, %v944_v42  ;;  %v1201_v55 = vpop.f32.mrb[9].mxu1 }
 0x316   :  { %v947_v56 = vpop.f32.mrb[10].mxu1 }
 0x317   :  { %950 = vst [vmem:[#allocation10] sm:$0xff] %v945_v54  ;;  %v1202_v57 = vpop.f32.mrb[11].mxu1 }
 0x318   :  { %1390 = shalt.err (!%p1387_p8)
}
 0x319   :  { %s1391_s6 = scalar_lea.hbm %s1573_s7, 128 }
 0x31a   :  { %p1392_p9 = scmp.ne.s32.totalorder %s1573_s7, %s1391_s6  ;;  %p1395_p10 = scmp.lt.u32.totalorder %s1391_s6, %s1573_s7 }
 0x31c   :  { %p1397_p11 = pnand %p1395_p10, %p1392_p9 }
 0x31e   :  { %1400 = shalt.err (!%p1397_p11)
}
 0x31f   :  { %960 = dma.vmem_to_hbm [thread:$0]  %s958_s29, 128, %s1573_s7, [#allocation4]  }
 0x320   :  { %1407 = dma.done.wait [#allocation4], 128  }
 0x321   :  { %1408 = vsyncadd [#allocation4], 4294967168 }
 0x322   :  { %964 = vsyncpa [#allocation3], 1 }
 0x323   :  { %965 = vsyncpa [#allocation6], 1 }
 0x324   :  { %966 = vsyncpa [#allocation9], 1 }
 0x325   :  { %967 = vsyncpa [#allocation4], 1 }

</bundles_post_ra>
